<compile_context>
chip_gen: v6e
topology: v6e:2x2x1
jax: 0.10.0
libtpu: 0.0.40
codegen_flags: <defaults>
</compile_context>

<pallas_src>
import functools

import jax
import jax.numpy as jnp
from jax import lax
from jax.experimental import pallas as pl
from jax.experimental.pallas import tpu as pltpu

LANES = 128      # vreg lane width (fast axis)
SUBLANES = 8     # f32 sublanes per vreg


def _default_compute_dtype():
    """bf16 on chips with a bf16 VPU (v6e/v7x); f32 on v5e and older."""
    try:
        kind = jax.devices()[0].device_kind.lower()
    except Exception:
        return jnp.float32
    for tag in ("v2", "v3", "v4", "v5"):
        if tag in kind:
            return jnp.float32
    return jnp.bfloat16


def _pick_strip_rows(tile_rows):
    """Largest divisor of tile_rows that is <= 64 rows and a multiple of 8."""
    for cand in (64, 56, 48, 40, 32, 24, 16, 8):
        if tile_rows % cand == 0:
            return cand
    return tile_rows


def mlp_kernel(x_ref, p_ref, o_ref, *, hidden, compute_dtype, strip_rows):
    """One (tile_rows, 128) batch tile; batch on lanes, params as SMEM scalars.

    y = W2 @ relu(W1 * x + b1) + b2, with the hidden-dim chain fully unrolled
    inside a strip-mined loop over sublane strips so the working set stays in
    vregs.  Everything is lane-dense VPU work with unmasked stores.
    """
    # Packed params: [w1(0:H), b1(H:2H), w2(2H:3H), b2(3H)] -- SMEM scalar reads,
    # hoisted out of the strip loop.
    w1 = [p_ref[j].astype(compute_dtype) for j in range(hidden)]
    b1 = [p_ref[hidden + j].astype(compute_dtype) for j in range(hidden)]
    w2 = [p_ref[2 * hidden + j].astype(compute_dtype) for j in range(hidden)]
    b2 = p_ref[3 * hidden].astype(compute_dtype)

    tile_rows = x_ref.shape[0]
    n_strips = tile_rows // strip_rows

    def strip(s):
        r0 = pl.multiple_of(s * strip_rows, strip_rows)
        x = x_ref[pl.ds(r0, strip_rows), :].astype(compute_dtype)
        acc = jnp.full(x.shape, b2, dtype=compute_dtype)   # b2 folded into init
        for j in range(hidden):                             # static unroll, H = 8
            h = jnp.maximum(x * w1[j] + b1[j], 0.0)
            acc = acc + h * w2[j]
        o_ref[pl.ds(r0, strip_rows), :] = acc.astype(o_ref.dtype)

    if n_strips == 1:
        strip(0)
    else:
        def body(s, carry):
            strip(s)
            return carry
        lax.fori_loop(0, n_strips, body, 0,
                      unroll=True if n_strips <= 8 else 2)


def pack_params(w1, b1, w2, b2):
    """Pre-pack nn.Linear params into ONE flat f32 vector (off the hot path).

    w1: (H, 1), b1: (H,), w2: (1, H), b2: (1,) -> f32[3H + 1].
    """
    return jnp.concatenate([
        w1.reshape(-1), b1.reshape(-1), w2.reshape(-1), b2.reshape(-1),
    ]).astype(jnp.float32)


def neural_network_forward(x, packed_params, *, max_tile_rows=2048,
                           compute_dtype=None):
    """x: (N, 1) -> (N, 1).  Batch mapped to lanes; grid tiles the batch."""
    if compute_dtype is None:
        compute_dtype = _default_compute_dtype()
    hidden = (packed_params.shape[0] - 1) // 3
    N = x.shape[0]

    # Lane-dense layout: view the batch as (rows, 128) vreg rows.
    rows = pl.cdiv(N, LANES)
    rows = pl.cdiv(rows, SUBLANES) * SUBLANES

    # Keep >= 2 tiles when there is enough work, so ("parallel",) actually
    # feeds both v7x TensorCores; otherwise one tile.
    if rows >= 2 * SUBLANES:
        half = (rows // 2 // SUBLANES) * SUBLANES
        tile_rows = max(SUBLANES, min(max_tile_rows, half))
    else:
        tile_rows = rows
    tile_rows = max(SUBLANES, (tile_rows // SUBLANES) * SUBLANES)

    num_tiles = pl.cdiv(rows, tile_rows)
    rows_total = num_tiles * tile_rows
    n_pad = rows_total * LANES
    strip_rows = _pick_strip_rows(tile_rows)

    # Skip the wrapper-side pad (a full extra HBM round-trip) when N is already
    # tile-aligned; the reshapes themselves are free.
    x_flat = x.reshape(-1)
    if n_pad != N:
        x_flat = jnp.pad(x_flat, (0, n_pad - N))
    x2d = x_flat.reshape(rows_total, LANES)

    out2d = pl.pallas_call(
        functools.partial(mlp_kernel, hidden=hidden,
                          compute_dtype=compute_dtype, strip_rows=strip_rows),
        out_shape=jax.ShapeDtypeStruct((rows_total, LANES), x.dtype),
        grid=(num_tiles,),
        in_specs=[
            pl.BlockSpec((tile_rows, LANES), lambda i: (i, 0)),        # x tile
            pl.BlockSpec(memory_space=pltpu.MemorySpace.SMEM),         # packed params
        ],
        out_specs=pl.BlockSpec((tile_rows, LANES), lambda i: (i, 0)),
        compiler_params=pltpu.CompilerParams(
            dimension_semantics=("parallel",),   # shard batch tiles across TCs
        ),
    )(x2d, packed_params)

    out_flat = out2d.reshape(-1)
    if n_pad != N:
        out_flat = out_flat[:N]
    return out_flat.reshape(N, 1)


def _torch_like_linear_init(key, out_features, in_features):
    """PyTorch nn.Linear default init: U(-1/sqrt(fan_in), 1/sqrt(fan_in))."""
    kw, kb = jax.random.split(key)
    bound = 1.0 / jnp.sqrt(jnp.asarray(in_features, jnp.float32))
    w = jax.random.uniform(kw, (out_features, in_features), jnp.float32,
                           minval=-bound, maxval=bound)
    b = jax.random.uniform(kb, (out_features,), jnp.float32,
                           minval=-bound, maxval=bound)
    return w, b


if __name__ == "__main__":
    key = jax.random.PRNGKey(0)
    k_x, k_x2, k_x3, k_l1, k_l2 = jax.random.split(key, 5)

    # layer_sizes = (1, 8, 1), output_bias = True, act_mod = ReLU
    layer_sizes = (1, 8, 1)
    N = 500  # train_N from the assignment

    # Deterministic synthetic input mirroring X = linspace(-3,3) + 0.1 + noise
    x_base = jnp.linspace(-3.0, 3.0, N).reshape(-1, 1) + 0.1
    x = (x_base + jax.random.normal(k_x, (N, 1)) * 0.1).astype(jnp.float32)

    w1, b1 = _torch_like_linear_init(k_l1, layer_sizes[1], layer_sizes[0])  # (8,1),(8,)
    w2, b2 = _torch_like_linear_init(k_l2, layer_sizes[2], layer_sizes[1])  # (1,8),(1,)
    params = pack_params(w1, b1, w2, b2)

    # Pure-JAX reference (same math as the PyTorch forward).
    ref = jnp.maximum(x @ w1.T + b1, 0.0) @ w2.T + b2

    # 1) Exact-math path (f32 compute) -- strict check, single tile.
    out_f32 = jax.block_until_ready(
        neural_network_forward(x, params, compute_dtype=jnp.float32))
    assert out_f32.shape == (N, 1)
    assert jnp.allclose(out_f32, ref, atol=1e-5), "f32 path mismatch vs reference"

    # 2) Auto path (bf16 compute on v6e/v7x, f32 on v5e/older) -- loose check.
    out_auto = jax.block_until_ready(neural_network_forward(x, params))
    assert out_auto.shape == (N, 1)
    assert jnp.allclose(out_auto, ref, atol=6e-2, rtol=6e-2), \
        "auto-dtype path mismatch vs reference"

    # 3) Aligned, multi-tile megacore path: N2 = 2048 -> 16 rows -> 2 tiles,
    #    no wrapper pad / output slice.
    N2 = 2048
    x2 = jax.random.normal(k_x2, (N2, 1), jnp.float32)
    ref2 = jnp.maximum(x2 @ w1.T + b1, 0.0) @ w2.T + b2
    out2 = jax.block_until_ready(
        neural_network_forward(x2, params, compute_dtype=jnp.float32))
    assert out2.shape == (N2, 1)
    assert jnp.allclose(out2, ref2, atol=1e-5), "multi-tile path mismatch"

    # 4) Large-tile strip-mined path: N3 = 2048*128 -> 2 tiles of 1024 rows,
    #    16 x 64-row strips per tile (fori_loop, unroll=2), no pad.
    N3 = 2048 * LANES
    x3 = jax.random.normal(k_x3, (N3, 1), jnp.float32)
    ref3 = jnp.maximum(x3 @ w1.T + b1, 0.0) @ w2.T + b2
    out3 = jax.block_until_ready(
        neural_network_forward(x3, params, compute_dtype=jnp.float32))
    assert out3.shape == (N3, 1)
    assert jnp.allclose(out3, ref3, atol=1e-5), "strip-mined path mismatch"

    print("KERNEL_OK")
</pallas_src>

<mosaic_0001>
module attributes {stable_mosaic.version = 11 : i64} {
  func.func @mlp_kernel(%arg0: i32, %arg1: memref<8x128xf32, #tpu.memory_space<vmem>>, %arg2: memref<25xf32, #tpu.memory_space<smem>>, %arg3: memref<8x128xf32, #tpu.memory_space<vmem>>) attributes {dimension_semantics = [#tpu.dimension_semantics<parallel>], iteration_bounds = array<i64: 1>, scalar_prefetch = 0 : i64, scratch_operands = 0 : i64, tpu.core_type = #tpu.core_type<tc>, window_params = [{transform_indices = @transform_0, window_bounds = array<i64: 8, 128>}, {transform_indices = @transform_1, window_bounds = array<i64: 25>}, {transform_indices = @transform_2, window_bounds = array<i64: 8, 128>}]} {
    %c0 = arith.constant 0 : index
    %0 = memref.load %arg2[%c0] : memref<25xf32, #tpu.memory_space<smem>>
    %c1 = arith.constant 1 : index
    %1 = memref.load %arg2[%c1] : memref<25xf32, #tpu.memory_space<smem>>
    %c2 = arith.constant 2 : index
    %2 = memref.load %arg2[%c2] : memref<25xf32, #tpu.memory_space<smem>>
    %c3 = arith.constant 3 : index
    %3 = memref.load %arg2[%c3] : memref<25xf32, #tpu.memory_space<smem>>
    %c4 = arith.constant 4 : index
    %4 = memref.load %arg2[%c4] : memref<25xf32, #tpu.memory_space<smem>>
    %c5 = arith.constant 5 : index
    %5 = memref.load %arg2[%c5] : memref<25xf32, #tpu.memory_space<smem>>
    %c6 = arith.constant 6 : index
    %6 = memref.load %arg2[%c6] : memref<25xf32, #tpu.memory_space<smem>>
    %c7 = arith.constant 7 : index
    %7 = memref.load %arg2[%c7] : memref<25xf32, #tpu.memory_space<smem>>
    %c8 = arith.constant 8 : index
    %8 = memref.load %arg2[%c8] : memref<25xf32, #tpu.memory_space<smem>>
    %c9 = arith.constant 9 : index
    %9 = memref.load %arg2[%c9] : memref<25xf32, #tpu.memory_space<smem>>
    %c10 = arith.constant 10 : index
    %10 = memref.load %arg2[%c10] : memref<25xf32, #tpu.memory_space<smem>>
    %c11 = arith.constant 11 : index
    %11 = memref.load %arg2[%c11] : memref<25xf32, #tpu.memory_space<smem>>
    %c12 = arith.constant 12 : index
    %12 = memref.load %arg2[%c12] : memref<25xf32, #tpu.memory_space<smem>>
    %c13 = arith.constant 13 : index
    %13 = memref.load %arg2[%c13] : memref<25xf32, #tpu.memory_space<smem>>
    %c14 = arith.constant 14 : index
    %14 = memref.load %arg2[%c14] : memref<25xf32, #tpu.memory_space<smem>>
    %c15 = arith.constant 15 : index
    %15 = memref.load %arg2[%c15] : memref<25xf32, #tpu.memory_space<smem>>
    %c16 = arith.constant 16 : index
    %16 = memref.load %arg2[%c16] : memref<25xf32, #tpu.memory_space<smem>>
    %c17 = arith.constant 17 : index
    %17 = memref.load %arg2[%c17] : memref<25xf32, #tpu.memory_space<smem>>
    %c18 = arith.constant 18 : index
    %18 = memref.load %arg2[%c18] : memref<25xf32, #tpu.memory_space<smem>>
    %c19 = arith.constant 19 : index
    %19 = memref.load %arg2[%c19] : memref<25xf32, #tpu.memory_space<smem>>
    %c20 = arith.constant 20 : index
    %20 = memref.load %arg2[%c20] : memref<25xf32, #tpu.memory_space<smem>>
    %c21 = arith.constant 21 : index
    %21 = memref.load %arg2[%c21] : memref<25xf32, #tpu.memory_space<smem>>
    %c22 = arith.constant 22 : index
    %22 = memref.load %arg2[%c22] : memref<25xf32, #tpu.memory_space<smem>>
    %c23 = arith.constant 23 : index
    %23 = memref.load %arg2[%c23] : memref<25xf32, #tpu.memory_space<smem>>
    %c24 = arith.constant 24 : index
    %24 = memref.load %arg2[%c24] : memref<25xf32, #tpu.memory_space<smem>>
    %c0_i32 = arith.constant 0 : i32
    %25 = tpu.assume_multiple %c0_i32, 8 : i32
    %26 = arith.index_cast %25 : i32 to index
    %c0_0 = arith.constant 0 : index
    %27 = vector.load %arg1[%26, %c0_0] : memref<8x128xf32, #tpu.memory_space<vmem>>, vector<8x128xf32>
    %28 = vector.broadcast %24 : f32 to vector<8x128xf32>
    %29 = vector.broadcast %0 : f32 to vector<8x128xf32>
    %30 = arith.mulf %27, %29 : vector<8x128xf32>
    %31 = vector.broadcast %8 : f32 to vector<8x128xf32>
    %32 = arith.addf %30, %31 : vector<8x128xf32>
    %cst = arith.constant 0.000000e+00 : f32
    %33 = vector.broadcast %cst : f32 to vector<8x128xf32>
    %34 = arith.maximumf %32, %33 : vector<8x128xf32>
    %35 = vector.broadcast %16 : f32 to vector<8x128xf32>
    %36 = arith.mulf %34, %35 : vector<8x128xf32>
    %37 = arith.addf %28, %36 : vector<8x128xf32>
    %38 = vector.broadcast %1 : f32 to vector<8x128xf32>
    %39 = arith.mulf %27, %38 : vector<8x128xf32>
    %40 = vector.broadcast %9 : f32 to vector<8x128xf32>
    %41 = arith.addf %39, %40 : vector<8x128xf32>
    %cst_1 = arith.constant 0.000000e+00 : f32
    %42 = vector.broadcast %cst_1 : f32 to vector<8x128xf32>
    %43 = arith.maximumf %41, %42 : vector<8x128xf32>
    %44 = vector.broadcast %17 : f32 to vector<8x128xf32>
    %45 = arith.mulf %43, %44 : vector<8x128xf32>
    %46 = arith.addf %37, %45 : vector<8x128xf32>
    %47 = vector.broadcast %2 : f32 to vector<8x128xf32>
    %48 = arith.mulf %27, %47 : vector<8x128xf32>
    %49 = vector.broadcast %10 : f32 to vector<8x128xf32>
    %50 = arith.addf %48, %49 : vector<8x128xf32>
    %cst_2 = arith.constant 0.000000e+00 : f32
    %51 = vector.broadcast %cst_2 : f32 to vector<8x128xf32>
    %52 = arith.maximumf %50, %51 : vector<8x128xf32>
    %53 = vector.broadcast %18 : f32 to vector<8x128xf32>
    %54 = arith.mulf %52, %53 : vector<8x128xf32>
    %55 = arith.addf %46, %54 : vector<8x128xf32>
    %56 = vector.broadcast %3 : f32 to vector<8x128xf32>
    %57 = arith.mulf %27, %56 : vector<8x128xf32>
    %58 = vector.broadcast %11 : f32 to vector<8x128xf32>
    %59 = arith.addf %57, %58 : vector<8x128xf32>
    %cst_3 = arith.constant 0.000000e+00 : f32
    %60 = vector.broadcast %cst_3 : f32 to vector<8x128xf32>
    %61 = arith.maximumf %59, %60 : vector<8x128xf32>
    %62 = vector.broadcast %19 : f32 to vector<8x128xf32>
    %63 = arith.mulf %61, %62 : vector<8x128xf32>
    %64 = arith.addf %55, %63 : vector<8x128xf32>
    %65 = vector.broadcast %4 : f32 to vector<8x128xf32>
    %66 = arith.mulf %27, %65 : vector<8x128xf32>
    %67 = vector.broadcast %12 : f32 to vector<8x128xf32>
    %68 = arith.addf %66, %67 : vector<8x128xf32>
    %cst_4 = arith.constant 0.000000e+00 : f32
    %69 = vector.broadcast %cst_4 : f32 to vector<8x128xf32>
    %70 = arith.maximumf %68, %69 : vector<8x128xf32>
    %71 = vector.broadcast %20 : f32 to vector<8x128xf32>
    %72 = arith.mulf %70, %71 : vector<8x128xf32>
    %73 = arith.addf %64, %72 : vector<8x128xf32>
    %74 = vector.broadcast %5 : f32 to vector<8x128xf32>
    %75 = arith.mulf %27, %74 : vector<8x128xf32>
    %76 = vector.broadcast %13 : f32 to vector<8x128xf32>
    %77 = arith.addf %75, %76 : vector<8x128xf32>
    %cst_5 = arith.constant 0.000000e+00 : f32
    %78 = vector.broadcast %cst_5 : f32 to vector<8x128xf32>
    %79 = arith.maximumf %77, %78 : vector<8x128xf32>
    %80 = vector.broadcast %21 : f32 to vector<8x128xf32>
    %81 = arith.mulf %79, %80 : vector<8x128xf32>
    %82 = arith.addf %73, %81 : vector<8x128xf32>
    %83 = vector.broadcast %6 : f32 to vector<8x128xf32>
    %84 = arith.mulf %27, %83 : vector<8x128xf32>
    %85 = vector.broadcast %14 : f32 to vector<8x128xf32>
    %86 = arith.addf %84, %85 : vector<8x128xf32>
    %cst_6 = arith.constant 0.000000e+00 : f32
    %87 = vector.broadcast %cst_6 : f32 to vector<8x128xf32>
    %88 = arith.maximumf %86, %87 : vector<8x128xf32>
    %89 = vector.broadcast %22 : f32 to vector<8x128xf32>
    %90 = arith.mulf %88, %89 : vector<8x128xf32>
    %91 = arith.addf %82, %90 : vector<8x128xf32>
    %92 = vector.broadcast %7 : f32 to vector<8x128xf32>
    %93 = arith.mulf %27, %92 : vector<8x128xf32>
    %94 = vector.broadcast %15 : f32 to vector<8x128xf32>
    %95 = arith.addf %93, %94 : vector<8x128xf32>
    %cst_7 = arith.constant 0.000000e+00 : f32
    %96 = vector.broadcast %cst_7 : f32 to vector<8x128xf32>
    %97 = arith.maximumf %95, %96 : vector<8x128xf32>
    %98 = vector.broadcast %23 : f32 to vector<8x128xf32>
    %99 = arith.mulf %97, %98 : vector<8x128xf32>
    %100 = arith.addf %91, %99 : vector<8x128xf32>
    %101 = arith.index_cast %25 : i32 to index
    %c0_8 = arith.constant 0 : index
    %102 = vector.load %arg3[%101, %c0_8] : memref<8x128xf32, #tpu.memory_space<vmem>>, vector<8x128xf32>
    tpu.vector_store %arg3[%101, %c0_8], %100 {strides = array<i32>} : memref<8x128xf32, #tpu.memory_space<vmem>>, vector<8x128xf32>,
    return
  }
  func.func @transform_0(%arg0: i32) -> (i32, i32) {
    %c0_i32 = arith.constant 0 : i32
    %c0_i32_0 = arith.constant 0 : i32
    return %arg0, %c0_i32 : i32, i32
  }
  func.func @transform_1(%arg0: i32) -> i32 {
    %c0_i32 = arith.constant 0 : i32
    %c0_i32_0 = arith.constant 0 : i32
    return %c0_i32 : i32
  }
  func.func @transform_2(%arg0: i32) -> (i32, i32) {
    %c0_i32 = arith.constant 0 : i32
    %c0_i32_0 = arith.constant 0 : i32
    return %arg0, %c0_i32 : i32, i32
  }
}

</mosaic_0001>

<bundles_post_ra>
// kernel: tpu_custom_call.1
= control target key start
LH: loop header
LB: loop body
LE: loop exit
PB: predicated region body
PF: predicated region fallthrough
CT: control target
= control target key end

     0   :  { %7 = vsyncpa [#allocation3], 0  ;;  %s302_s0 = inlined_call_operand.hbm [shape: f32[8,128], index: 0, kind: input, shape index: {}]   ;;  %s303_s1 = inlined_call_operand.vmem [shape: f32[25], index: 1, kind: input, shape index: {}]   ;;  %s304_s2 = inlined_call_operand.hbm [shape: f32[8,128], index: 2, kind: output, shape index: {}]  }
   0x1   :  { %8 = vsyncpa [#allocation5], 0 }
   0x2   :  { %9 = vsyncpa [#allocation4], 0  ;;  %s26_s11 = sshll.u32 %s303_s1, 4  ;;  %s230_s12 = smov [#allocation2]   ;;  %s27_s11 = int_to_ptr.vmem [resolvable:$true] %s26_s11 }
   0x3   :  { %s16_s13 = sshll.u32 %s230_s12, 4  ;;  %s17_s13 = int_to_ptr.vmem [resolvable:$true] %s16_s13 }
   0x4   :  { %s180_s14 = scalar_lea.vmem %s17_s13, 128  ;;  %p185_p1 = scmp.lt.s32.totalorder %s17_s13, %s17_s13 }
   0x5   :  { %p181_p0 = scmp.ne.s32.totalorder %s17_s13, %s180_s14  ;;  %p186_p2 = scmp.lt.s32.totalorder %s180_s14, %s180_s14 }
   0x7   :  { %p187_p3 = por %p186_p2, %p185_p1 }
   0x9   :  { %p188_p4 = pnand %p187_p3, %p181_p0 }
   0xb   :  { %191 = shalt.err (!%p188_p4)
}
   0xc   :  { %19 = dma.hbm_to_vmem [thread:$0]  %s302_s0, 128, %s17_s13, [#allocation3]  }
   0xd   :  { %s192_s17 = scalar_lea.vmem %s27_s11, 16  ;;  %p197_p6 = scmp.lt.s32.totalorder %s27_s11, %s27_s11 }
   0xe   :  { %p193_p5 = scmp.ne.s32.totalorder %s27_s11, %s192_s17  ;;  %p198_p7 = scmp.lt.s32.totalorder %s192_s17, %s192_s17 }
  0x10   :  { %p199_p8 = por %p198_p7, %p197_p6 }
  0x12   :  { %p200_p9 = pnand %p199_p8, %p193_p5 }
  0x14   :  { %203 = shalt.err (!%p200_p9)
}
  0x15   :  { %s231_s1 = smov [#allocation6]  }
  0x16   :  { %29 = dma.vmem_to_smem %s27_s11, 16, %s231_s1, [#allocation5]  }
  0x17   :  { %224 = dma.done.wait [#allocation3], 128  }
  0x18   :  { %225 = vsyncadd [#allocation3], 4294967168 }
  0x19   :  { %226 = dma.done.wait [#allocation5], 16  }
  0x1a   :  { %227 = vsyncadd [#allocation5], 4294967280 }
  0x1b   :  { %36 = sfence }
  0x1c   :  { %s37_s18 = sld [smem:[#allocation6]]  ;;  %v62_v0 = vld [vmem:[#allocation2] sm:$0xff]  ;;  %s232_s14 = smov [#allocation7]  }
  0x1d   :  { %s145_s19 = sld [smem:[#allocation6 + $0x1]]  ;;  %s135_s15 = sshll.u32 %s232_s14, 4  ;;  %s136_s15 = int_to_ptr.vmem [resolvable:$true] %s135_s15 }
  0x1e   :  { %s146_s20 = sld [smem:[#allocation6 + $0x2]]  ;;  %s204_s16 = scalar_lea.vmem %s136_s15, 128 }
  0x1f   :  { %s147_s21 = sld [smem:[#allocation6 + $0x3]]  ;;  %p205_p10 = scmp.ne.s32.totalorder %s136_s15, %s204_s16 }
  0x20   :  { %s254_s22 = sld [smem:[#allocation6 + $0x4]]  ;;  %p209_p11 = scmp.lt.s32.totalorder %s136_s15, %s136_s15 }
  0x21   :  { %s152_s0 = sld [smem:[#allocation6 + $0x8]]  ;;  %p210_p12 = scmp.lt.s32.totalorder %s204_s16, %s204_s16 }
  0x22   :  { %s256_s23 = sld [smem:[#allocation6 + $0x5]]  ;;  %v64_v1 = vstv %s37_s18 }
  0x23   :  { %s153_s24 = sld [smem:[#allocation6 + $0x9]]  ;;  %v72_v2 = vstv %s145_s19  ;;  %v65_v3 = vmul.f32 %v64_v1, %v62_v0  ;;  %p211_p13 = por %p210_p12, %p209_p11 }
  0x24   :  { %s258_s25 = sld [smem:[#allocation6 + $0x6]]  ;;  %v80_v5 = vstv %s146_s20  ;;  %v73_v6 = vmul.f32 %v72_v2, %v62_v0 }
  0x25   :  { %s154_s26 = sld [smem:[#allocation6 + $0xa]]  ;;  %v88_v8 = vstv %s147_s21  ;;  %v81_v10 = vmul.f32 %v80_v5, %v62_v0  ;;  %p212_p0 = pnand %p211_p13, %p205_p10 }
  0x26   :  { %s260_s27 = sld [smem:[#allocation6 + $0x7]]  ;;  %v96_v12 = vstv %s254_s22  ;;  %v89_v14 = vmul.f32 %v88_v8, %v62_v0 }
  0x27   :  { %s262_s28 = sld [smem:[#allocation6 + $0xb]]  ;;  %v66_v4 = vstv %s152_s0  ;;  %v97_v19 = vmul.f32 %v96_v12, %v62_v0 }
  0x28   :  { %s264_s29 = sld [smem:[#allocation6 + $0xc]]  ;;  %v67_v9 = vadd.f32 %v66_v4, %v65_v3  ;;  %v104_v16 = vstv %s256_s23 }
  0x29   :  { %s266_s30 = sld [smem:[#allocation6 + $0x10]]  ;;  %v74_v7 = vstv %s153_s24  ;;  %v105_v25 = vmul.f32 %v104_v16, %v62_v0 }
  0x2a   :  { %s268_s3 = sld [smem:[#allocation6 + $0xd]]  ;;  %v75_v13 = vadd.f32 %v74_v7, %v73_v6  ;;  %v68_v17 = vmax.f32 %v67_v9, 0.0  ;;  %v112_v22 = vstv %s258_s25 }
  0x2b   :  { %s270_s4 = sld [smem:[#allocation6 + $0x11]]  ;;  %v82_v11 = vstv %s154_s26  ;;  %v113_v32 = vmul.f32 %v112_v22, %v62_v0 }
  0x2c   :  { %s272_s5 = sld [smem:[#allocation6 + $0xe]]  ;;  %v83_v18 = vadd.f32 %v82_v11, %v81_v10  ;;  %v76_v23 = vmax.f32 %v75_v13, 0.0  ;;  %v120_v28 = vstv %s260_s27 }
  0x2d   :  { %s274_s6 = sld [smem:[#allocation6 + $0x12]]  ;;  %v90_v15 = vstv %s262_s28  ;;  %v121_v38 = vmul.f32 %v120_v28, %v62_v0 }
  0x2e   :  { %s277_s7 = sld [smem:[#allocation6 + $0xf]]  ;;  %v98_v21 = vstv %s264_s29  ;;  %v91_v24 = vadd.f32 %v90_v15, %v89_v14  ;;  %v84_v30 = vmax.f32 %v83_v18, 0.0 }
  0x2f   :  { %s279_s8 = sld [smem:[#allocation6 + $0x13]]  ;;  %v69_v20 = vstv %s266_s30  ;;  %v99_v31 = vadd.f32 %v98_v21, %v97_v19 }
  0x30   :  { %s283_s9 = sld [smem:[#allocation6 + $0x14]]  ;;  %v106_v27 = vstv %s268_s3  ;;  %v70_v29 = vmul.f32 %v69_v20, %v68_v17  ;;  %v92_v36 = vmax.f32 %v91_v24, 0.0 }
  0x31   :  { %s168_s10 = sld [smem:[#allocation6 + $0x18]]  ;;  %v77_v26 = vstv %s270_s4  ;;  %v107_v37 = vadd.f32 %v106_v27, %v105_v25  ;;  %v100_v44 = vmax.f32 %v99_v31, 0.0 }
  0x32   :  { %s288_s11 = sld [smem:[#allocation6 + $0x15]]  ;;  %v114_v34 = vstv %s272_s5  ;;  %v78_v35 = vmul.f32 %v77_v26, %v76_v23 }
  0x33   :  { %s166_s12 = sld [smem:[#allocation6 + $0x16]]  ;;  %v85_v33 = vstv %s274_s6  ;;  %v115_v45 = vadd.f32 %v114_v34, %v113_v32  ;;  %v108_v49 = vmax.f32 %v107_v37, 0.0 }
  0x34   :  { %s167_s13 = sld [smem:[#allocation6 + $0x17]]  ;;  %v122_v41 = vstv %s277_s7  ;;  %v86_v43 = vmul.f32 %v85_v33, %v84_v30 }
  0x35   :  { %v93_v40 = vstv %s279_s8  ;;  %v123_v50 = vadd.f32 %v122_v41, %v121_v38  ;;  %v116_v54 = vmax.f32 %v115_v45, 0.0 }
  0x36   :  { %v101_v46 = vstv %s283_s9  ;;  %v94_v48 = vmul.f32 %v93_v40, %v92_v36 }
  0x37   :  { %v63_v39 = vstv %s168_s10  ;;  %v102_v53 = vmul.f32 %v101_v46, %v100_v44  ;;  %v124_v58 = vmax.f32 %v123_v50, 0.0 }
  0x38   :  { %v71_v42 = vadd.f32 %v70_v29, %v63_v39  ;;  %v109_v51 = vstv %s288_s11 }
  0x39   :  { %v117_v55 = vstv %s166_s12  ;;  %v110_v57 = vmul.f32 %v109_v51, %v108_v49 }
  0x3a   :  { %v79_v47 = vadd.f32 %v78_v35, %v71_v42  ;;  %v125_v59 = vstv %s167_s13  ;;  %v118_v61 = vmul.f32 %v117_v55, %v116_v54 }
  0x3b   :  { %v126_v63 = vmul.f32 %v125_v59, %v124_v58 }
  0x3c   :  { %v87_v52 = vadd.f32 %v86_v43, %v79_v47 }
  0x3e   :  { %v95_v56 = vadd.f32 %v94_v48, %v87_v52 }
  0x40   :  { %v103_v60 = vadd.f32 %v102_v53, %v95_v56 }
  0x42   :  { %v111_v62 = vadd.f32 %v110_v57, %v103_v60 }
  0x44   :  { %v119_v0 = vadd.f32 %v118_v61, %v111_v62 }
  0x46   :  { %v127_v1 = vadd.f32 %v126_v63, %v119_v0 }
  0x48   :  { %128 = vst [vmem:[#allocation7] sm:$0xff] %v127_v1 }
  0x49   :  { %215 = shalt.err (!%p212_p0)
}
  0x4a   :  { %138 = dma.vmem_to_hbm [thread:$0]  %s136_s15, 128, %s304_s2, [#allocation4]  }
  0x4b   :  { %228 = dma.done.wait [#allocation4], 128  }
  0x4c   :  { %229 = vsyncadd [#allocation4], 4294967168 }
  0x4d   :  { %142 = vsyncpa [#allocation3], 1 }
  0x4e   :  { %143 = vsyncpa [#allocation4], 1 }
  0x4f   :  { %144 = vsyncpa [#allocation5], 1 }

</bundles_post_ra>
